<compile_context>
chip_gen: v7x
topology: tpu7x:2x2x1
jax: 0.10.0
libtpu: 0.0.40
codegen_flags: <defaults>
</compile_context>

<pallas_src>
import jax
import jax.numpy as jnp
from jax.experimental import pallas as pl
from jax.experimental.pallas import tpu as pltpu


def temp_module_kernel(t_ref, emb_ref, out_ref):
    # t_ref:   (1, 1) scalar temperature parameter in SMEM
    # emb_ref: (N, TN) column strip of embeddings in VMEM (full reduction axis)
    # out_ref: (1, TN) per-column diagonal softmax probabilities
    j = pl.program_id(0)
    tn = out_ref.shape[1]

    t = t_ref[0, 0]
    scale = jnp.exp(t)

    # Scaled logits for this column strip; softmax is over axis 0 (rows).
    s = emb_ref[...].astype(jnp.float32) * scale            # (N, TN)
    m = jnp.max(s, axis=0, keepdims=True)                   # (1, TN) column max
    den = jnp.sum(jnp.exp(s - m), axis=0, keepdims=True)    # (1, TN) column denom

    # Diagonal entries of this strip live in rows [j*TN, (j+1)*TN).
    # Slice just that (TN, TN) sub-block from the ref and mask with small iotas.
    row_off = pl.multiple_of(j * tn, tn)
    dblk = emb_ref[pl.ds(row_off, tn), :].astype(jnp.float32) * scale  # (TN, TN)
    rows = jax.lax.broadcasted_iota(jnp.int32, (tn, tn), 0)
    cols = jax.lax.broadcasted_iota(jnp.int32, (tn, tn), 1)
    diag = jnp.sum(jnp.where(rows == cols, dblk, 0.0), axis=0, keepdims=True)  # (1, TN)

    # Per-column diagonal probability.  Exact divide on a (1, TN) row is cheap
    # and keeps us safely inside the 1e-5 tolerance.
    out_ref[...] = jnp.exp(diag - m) / den


def _pick_strip_width(n: int, vmem_budget_bytes: int) -> int:
    """Largest lane-aligned column-strip width (<=512) fitting the VMEM budget."""
    if n % 128 != 0:
        # Small / irregular N: single full block (block dims equal array dims).
        return n
    tn = 128
    # Budget ~3x strip bytes in f32 (double-buffered input + f32 temporaries).
    while (n % (tn * 2) == 0) and (3 * n * (tn * 2) * 4 <= vmem_budget_bytes) and (tn * 2 <= 512):
        tn *= 2
    return tn


def temp_module_forward(embeddings: jax.Array, t: jax.Array, *, tn: int | None = None) -> jax.Array:
    """Compute -softmax(embeddings * exp(t), dim=0).diag().sum() via Pallas."""
    N, M = embeddings.shape
    assert N == M, "diag() requires a square embeddings matrix"

    if tn is None:
        # Conservative budget that fits the default scoped VMEM on all of
        # v5e (16 MiB), v6e (32 MiB) and v7x (32 MiB scoped / 64 MiB physical).
        tn = _pick_strip_width(N, vmem_budget_bytes=12 * 1024 * 1024)
    assert N % tn == 0, "strip width must divide N"
    grid = (N // tn,)

    t_arr = jnp.reshape(t.astype(jnp.float32), (1, 1))

    out = pl.pallas_call(
        temp_module_kernel,
        out_shape=jax.ShapeDtypeStruct((1, N), jnp.float32),
        grid=grid,
        in_specs=[
            pl.BlockSpec(memory_space=pltpu.SMEM),            # t (scalar, untiled)
            pl.BlockSpec((N, tn), lambda j: (0, j)),          # column strip, full rows
        ],
        out_specs=pl.BlockSpec((1, tn), lambda j: (0, j)),    # lane-dense partials
        compiler_params=pltpu.CompilerParams(
            dimension_semantics=("parallel",),                # no shared accumulator -> safe
        ),
    )(t_arr, embeddings)

    # Tiny final reduction + negation outside the hot path.
    return -jnp.sum(out)


def reference_forward(embeddings: jax.Array, t: jax.Array) -> jax.Array:
    p = jax.nn.softmax(embeddings.astype(jnp.float32) * jnp.exp(t), axis=0)
    return -jnp.sum(jnp.diagonal(p))


if __name__ == "__main__":
    key = jax.random.PRNGKey(0)
    N = 256  # square embeddings matrix (small, but big enough to exercise tiling)
    embeddings = jax.random.normal(key, (N, N), dtype=jnp.float32)
    # nn.Parameter(torch.ones([]) * 0) -> scalar t initialized to 0.
    t = jnp.zeros((), dtype=jnp.float32)

    # Use TN=128 so the 1-D column-strip grid has >1 step (grid=(2,)).
    loss = temp_module_forward(embeddings, t, tn=128)
    jax.block_until_ready(loss)

    ref = reference_forward(embeddings, t)
    assert jnp.allclose(loss, ref, rtol=1e-5, atol=1e-5), (loss, ref)

    print("KERNEL_OK")
</pallas_src>

<mosaic_0001>
module attributes {stable_mosaic.version = 11 : i64} {
  func.func @temp_module_kernel(%arg0: i32, %arg1: memref<1x1xf32, #tpu.memory_space<smem>>, %arg2: memref<256x128xf32, #tpu.memory_space<vmem>>, %arg3: memref<1x128xf32, #tpu.memory_space<vmem>>) attributes {dimension_semantics = [#tpu.dimension_semantics<parallel>], iteration_bounds = array<i64: 2>, scalar_prefetch = 0 : i64, scratch_operands = 0 : i64, tpu.core_type = #tpu.core_type<tc>, window_params = [{transform_indices = @transform_0, window_bounds = array<i64: 1, 1>}, {transform_indices = @transform_1, window_bounds = array<i64: 256, 128>}, {transform_indices = @transform_2, window_bounds = array<i64: 1, 128>}]} {
    %c0 = arith.constant 0 : index
    %c0_0 = arith.constant 0 : index
    %0 = memref.load %arg1[%c0, %c0_0] : memref<1x1xf32, #tpu.memory_space<smem>>
    %1 = math.exp %0 : f32
    %c0_1 = arith.constant 0 : index
    %c0_2 = arith.constant 0 : index
    %2 = vector.load %arg2[%c0_1, %c0_2] : memref<256x128xf32, #tpu.memory_space<vmem>>, vector<256x128xf32>
    %3 = vector.broadcast %1 : f32 to vector<256x128xf32>
    %4 = arith.mulf %2, %3 : vector<256x128xf32>
    %cst = arith.constant dense<0xFF800000> : vector<128xf32>
    %5 = vector.multi_reduction <maximumf>, %4, %cst [0] : vector<256x128xf32> to vector<128xf32>
    %6 = vector.shape_cast %5 : vector<128xf32> to vector<1x128xf32>
    %7 = vector.broadcast %6 : vector<1x128xf32> to vector<256x128xf32>
    %8 = arith.subf %4, %7 : vector<256x128xf32>
    %9 = math.exp %8 : vector<256x128xf32>
    %cst_3 = arith.constant dense<0.000000e+00> : vector<128xf32>
    %10 = vector.multi_reduction <add>, %9, %cst_3 [0] : vector<256x128xf32> to vector<128xf32>
    %11 = vector.shape_cast %10 : vector<128xf32> to vector<1x128xf32>
    %c128_i32 = arith.constant 128 : i32
    %12 = arith.muli %arg0, %c128_i32 : i32
    %13 = tpu.assume_multiple %12, 128 : i32
    %14 = arith.index_cast %13 : i32 to index
    %c0_4 = arith.constant 0 : index
    %15 = vector.load %arg2[%14, %c0_4] : memref<256x128xf32, #tpu.memory_space<vmem>>, vector<128x128xf32>
    %16 = vector.broadcast %1 : f32 to vector<128x128xf32>
    %17 = arith.mulf %15, %16 : vector<128x128xf32>
    %18 = tpu.iota {dimensions = array<i32: 0>} : vector<128x128xi32>
    %19 = tpu.iota {dimensions = array<i32: 1>} : vector<128x128xi32>
    %20 = arith.cmpi eq, %18, %19 : vector<128x128xi32>
    %cst_5 = arith.constant 0.000000e+00 : f32
    %21 = vector.broadcast %cst_5 : f32 to vector<128x128xf32>
    %22 = arith.select %20, %17, %21 : vector<128x128xi1>, vector<128x128xf32>
    %cst_6 = arith.constant dense<0.000000e+00> : vector<128xf32>
    %23 = vector.multi_reduction <add>, %22, %cst_6 [0] : vector<128x128xf32> to vector<128xf32>
    %24 = vector.shape_cast %23 : vector<128xf32> to vector<1x128xf32>
    %25 = arith.subf %24, %6 : vector<1x128xf32>
    %26 = math.exp %25 : vector<1x128xf32>
    %27 = arith.divf %26, %11 : vector<1x128xf32>
    %c0_7 = arith.constant 0 : index
    %c0_8 = arith.constant 0 : index
    %28 = vector.load %arg3[%c0_7, %c0_8] : memref<1x128xf32, #tpu.memory_space<vmem>>, vector<1x128xf32>
    tpu.vector_store %arg3[%c0_7, %c0_8], %27 {strides = array<i32>} : memref<1x128xf32, #tpu.memory_space<vmem>>, vector<1x128xf32>,
    return
  }
  func.func @transform_0(%arg0: i32) -> (i32, i32) {
    %c0_i32 = arith.constant 0 : i32
    %c0_i32_0 = arith.constant 0 : i32
    %c0_i32_1 = arith.constant 0 : i32
    return %c0_i32, %c0_i32_0 : i32, i32
  }
  func.func @transform_1(%arg0: i32) -> (i32, i32) {
    %c0_i32 = arith.constant 0 : i32
    %c0_i32_0 = arith.constant 0 : i32
    return %c0_i32, %arg0 : i32, i32
  }
  func.func @transform_2(%arg0: i32) -> (i32, i32) {
    %c0_i32 = arith.constant 0 : i32
    %c0_i32_0 = arith.constant 0 : i32
    return %c0_i32, %arg0 : i32, i32
  }
}

</mosaic_0001>

<bundles_post_ra>
// kernel: tpu_custom_call.1
= control target key start
LH: loop header
LB: loop body
LE: loop exit
PB: predicated region body
PF: predicated region fallthrough
CT: control target
= control target key end

     0   :  { %s1333_s0 = inlined_call_operand.<no memory space> [shape: f32[1,1], index: 0, kind: input, shape index: {}]   ;;  %s1334_s1 = inlined_call_operand.hbm [shape: f32[256,256], index: 1, kind: input, shape index: {}]   ;;  %s1335_s2 = inlined_call_operand.hbm [shape: f32[1,256], index: 2, kind: output, shape index: {}]  }
   0x1   :  { %7 = sst [smem:[#allocation2]] %s1333_s0 }
   0x2   :  { %8 = vsyncpa [#allocation4], 0 }
   0x3   :  { %10 = vsyncpa [#allocation4 + $0x1], 0 }
   0x4   :  { %11 = vsyncpa [#allocation5], 0 }
   0x5   :  { %13 = vsyncpa [#allocation5 + $0x1], 0  ;;  %s847_s11 = smov 0   ;;  %s849_s12 = smov 0  }
   0x6   :  { %s851_s13 = smov 0   ;;  %s853_s14 = smov 0  }
   0x7 LB: > { %s868_s0 = sadd.s32 4294967295, %s822_s14   ;;  %s594_s15 = sadd.s32 4294967294, %s822_s14   ;;  %s822_s14 = sphi %s853_s14, %s1349_s14   ;;  %s818_s13 = sphi %s851_s13, %s1348_s13   ;;  %s814_s12 = sphi %s849_s12, %s1347_s12   ;;  %s810_s11 = sphi %s847_s11, %s1346_s11  }
   0x8   : > { %s872_s16 = sadd.s32 1, %s822_s14   ;;  %s47_s17 = sadd.s32 1, %s818_s13 }
   0x9   : > { %s44_s18 = ssub.s32 %s822_s14, %s872_s16  ;;  %p54_p0 = scmp.ne.s32.totalorder %s818_s13, %s814_s12 }
   0xa   : > { %p45_p1 = scmp.eq.s32.totalorder %s44_s18, 0  ;;  %p55_p2 = scmp.eq.s32.totalorder %s822_s14, 0 }
   0xb   : > { %p60_p3 = scmp.ne.s32.totalorder %s814_s12, %s810_s11  ;;  %p61_p4 = scmp.eq.s32.totalorder %s868_s0, 0 }
   0xc   : > { %s884_s19 = scalar_select %p45_p1, %s818_s13, %s47_s17  }
   0xd   : > { %p886_p5 = por %p55_p2, %p54_p0  ;;  %p890_p6 = por %p61_p4, %p60_p3 }
   0xe   : > { %p84_p7 = scmp.eq.s32.totalorder %s868_s0, 1  ;;  %p90_p8 = scmp.eq.s32.totalorder %s594_s15, 1 }
   0xf   : > { %p619_p10 = scmp.lt.s32.totalorder %s822_s14, 2  ;;  %s113_s24 = sand.u32 1, %s818_s13  }
  0x10   : > { %p897_p11 = por %p84_p7, %p54_p0  ;;  %p901_p12 = por %p90_p8, %p60_p3 }
  0x11   : > { %s598_s25 = sshll.u32 %s822_s14, 7  ;;  %s597_s26 = sshll.u32 %s113_s24, 8 }
  0x12   : > { %s1339_s22 = scalar_select %p897_p11, 1, 0 }
  0x13   : > { %s1340_s23 = scalar_select %p901_p12, 1, 0 }
  0x14   : > { %s910_s29 = scalar_lea.hbm %s1334_s1, %s598_s25  ;;  %s117_s30 = scalar_lea.vmem [#allocation3], %s597_s26 }
  0x15   : > { %s123_s3 = sshll.u32 %s117_s30, 4  ;;  %p914_p13 = pnand %p619_p10, %p886_p5  ;;  %s918_s3 = int_to_ptr.vmem [resolvable:$true] %s123_s3 }
  0x16   : > { %s921_s5 = scalar_lea.sflag [#allocation4], %s113_s24  ;;  %s726_s6 = scalar_lea.hbm %s910_s29, 4096 }
  0x17   : > { %p727_p1 = scmp.ne.s32.totalorder %s910_s29, %s726_s6  ;;  %p728_p2 = pneg %p914_p13 }
  0x18   : > { %s731_s9 = scalar_lea.hbm %s1334_s1, 8192  ;;  %p732_p5 = scmp.lt.u32.totalorder %s910_s29, %s1334_s1 }
  0x19   : > { %p729_p3 = pnand %p728_p2, %p727_p1  ;;  %p733_p7 = scmp.lt.u32.totalorder %s731_s9, %s726_s6 }
  0x1a   : > { %p735_p10 = scmp.lt.u32.totalorder %s726_s6, %s910_s29 }
  0x1b   : > { %p730_p4 = pneg %p729_p3  ;;  %p734_p8 = por %p733_p7, %p732_p5 }
  0x1d   : > { %p736_p9 = por %p735_p10, %p734_p8 }
  0x1f   : > { %p737_p0 = pnand %p736_p9, %p730_p4 }
  0x21   : > { %740 = shalt.err (!%p737_p0)
}
  0x22   : > { %s741_s17 = scalar_lea.vmem %s918_s3, 4096  ;;  %s824_s18 = smov [#allocation3]  }
  0x23   : > { %p742_p1 = scmp.ne.s32.totalorder %s918_s3, %s741_s17  ;;  %s746_s20 = sshll.u32 %s824_s18, 4  ;;  %s747_s20 = int_to_ptr.vmem [resolvable:$false] %s746_s20 }
  0x24   : > { %s748_s24 = scalar_lea.vmem %s747_s20, 8192  ;;  %p749_p11 = scmp.lt.s32.totalorder %s918_s3, %s747_s20 }
  0x25   : > { %p744_p3 = pnand %p742_p1, %p728_p2  ;;  %p750_p5 = scmp.lt.s32.totalorder %s748_s24, %s741_s17 }
  0x27   : > { %p745_p12 = pneg %p744_p3  ;;  %p751_p7 = por %p750_p5, %p749_p11 }
  0x29   : > { %p752_p8 = pnand %p751_p7, %p745_p12 }
  0x2b   : > { %755 = shalt.err (!%p752_p8)
}
  0x2c   : > { %s825_s25 = smov 256   ;;  %s826_s26 = smov 128  }
  0x2d   : > { %s827_s27 = smov 8   ;;  %p131_p9 = scmp.lt.s32.totalorder %s822_s14, 3 }
  0x2e   : > { %614 = dma.hbm_to_vmem [thread:$0]  (!%p914_p13), %s910_s29, 4096, %s918_s3, %s921_s5, %s825_s25, %s826_s26, %s827_s27  }
  0x2f   : > { %p1342_p0 = scmp.ge.s32.totalorder %s822_s14, 1 }
  0x31   : > { %p132_p2 = pnand %p1342_p0, %p131_p9 }
  0x32   : > { %s953_s28 = sand.u32 (!%p132_p2), 1, %s814_s12  }
  0x33   : > { %135 = sbr.rel (%p132_p2) target bundleno = 281 (0x119), region = 28  ;;  %s600_s30 = sshll.u32 (!%p132_p2), %s953_s28, 8 }
  0x34   : > { %s138_s6 = scalar_lea.sflag (!%p132_p2), [#allocation4], %s953_s28  ;;  %s957_s7 = scalar_lea.vmem (!%p132_p2), [#allocation3], %s600_s30 }
  0x3a   : > { %801 = dma.done.wait (%p890_p6), %s138_s6, 4096  }
  0x3b   : > { %803 = vsyncadd (%p890_p6), %s138_s6, 4294963200  ;;  %s161_s29 = sld [smem:[#allocation2]]  ;;  %v435_v3 = vlaneseq  ;;  %v166_v5 = vld [vmem:[%s957_s7] sm:$0xff]  ;;  %v167_v6 = vld [vmem:[%s957_s7 + $0x8] sm:$0xff]  ;;  %s601_s3 = sshll.u32 %s868_s0, 7 }
  0x3c   : > { %v168_v7 = vld [vmem:[%s957_s7 + $0x10] sm:$0xff]  ;;  %v169_v8 = vld [vmem:[%s957_s7 + $0x18] sm:$0xff]  ;;  %v170_v9 = vld [vmem:[%s957_s7 + $0x20] sm:$0xff]  ;;  %s1066_s4 = scalar_lea.vmem %s957_s7, %s601_s3 [#allocation3]  ;;  %s602_s5 = sshll.u32 %s868_s0, 4 }
  0x3d   : > { %v963_v4 = vshrl.u32 %v435_v3, 7  ;;  %v171_v11 = vld [vmem:[%s957_s7 + $0x28] sm:$0xff]  ;;  %v172_v12 = vld [vmem:[%s957_s7 + $0x30] sm:$0xff]  ;;  %v173_v13 = vld [vmem:[%s957_s7 + $0x38] sm:$0xff]  ;;  %v978_v15 = vand.u32 127, %v435_v3  ;;  %s160_s8 = scalar_lea.vmem [#allocation6], %s953_s28  ;;  %s1289_s17 = scalar_lea.hbm %s1335_s2, %s602_s5 }
  0x3e   : > { %v174_v16 = vld [vmem:[%s957_s7 + $0x40] sm:$0xff]  ;;  %v175_v17 = vld [vmem:[%s957_s7 + $0x48] sm:$0xff]  ;;  %v176_v18 = vld [vmem:[%s957_s7 + $0x50] sm:$0xff]  ;;  %s526_s9 = sshll.u32 %s160_s8, 4  ;;  %s514_s18 = scalar_lea.sflag [#allocation5], %s953_s28  ;;  %s1291_s9 = int_to_ptr.vmem [resolvable:$true] %s526_s9 }
  0x3f   : > { %v976_v14 = vadd.s32 8, %v963_v4  ;;  %v177_v23 = vld [vmem:[%s957_s7 + $0x58] sm:$0xff]  ;;  %v178_v24 = vld [vmem:[%s957_s7 + $0x60] sm:$0xff]  ;;  %v179_v25 = vld [vmem:[%s957_s7 + $0x68] sm:$0xff]  ;;  %v1022_v36 = vadd.s32 16, %v963_v4  ;;  %vm454_vm0 = vcmp.eq.s32.totalorder %v963_v4, %v978_v15  ;;  %s756_s20 = scalar_lea.vmem %s1291_s9, 16 }
  0x40   : > { %v180_v30 = vld [vmem:[%s957_s7 + $0x70] sm:$0xff]  ;;  %v181_v31 = vld [vmem:[%s957_s7 + $0x78] sm:$0xff]  ;;  %v182_v32 = vld [vmem:[%s957_s7 + $0x80] sm:$0xff]  ;;  %p757_p6 = scmp.ne.s32.totalorder %s1291_s9, %s756_s20  ;;  %p1343_p11 = scmp.ne.s32.totalorder %s1339_s22, 0 }
  0x41   : > { %v162_v0 = vstv %s161_s29  ;;  %v183_v33 = vld [vmem:[%s957_s7 + $0x88] sm:$0xff]  ;;  %v184_v37 = vld [vmem:[%s957_s7 + $0x90] sm:$0xff]  ;;  %v185_v42 = vld [vmem:[%s957_s7 + $0x98] sm:$0xff]  ;;  %vm455_vm1 = vcmp.eq.s32.totalorder %v976_v14, %v978_v15  ;;  %vm456_vm2 = vcmp.eq.s32.totalorder %v1022_v36, %v978_v15  ;;  %s828_s0 = smov [#allocation6]  }
  0x42   : > { %v163_v1 = vmul.f32 1.442695, %v162_v0  ;;  %v186_v43 = vld [vmem:[%s957_s7 + $0xa0] sm:$0xff]  ;;  %v187_v44 = vld [vmem:[%s957_s7 + $0xa8] sm:$0xff]  ;;  %v188_v49 = vld [vmem:[%s957_s7 + $0xb0] sm:$0xff]  ;;  %p758_p12 = pnand %p757_p6, %p1343_p11  ;;  %s760_s24 = sshll.u32 %s828_s0, 4  ;;  %s761_s24 = int_to_ptr.vmem [resolvable:$false] %s760_s24 }
  0x43   : > { %v189_v54 = vld [vmem:[%s957_s7 + $0xb8] sm:$0xff]  ;;  %v190_v55 = vld [vmem:[%s957_s7 + $0xc0] sm:$0xff]  ;;  %v191_v56 = vld [vmem:[%s957_s7 + $0xc8] sm:$0xff]  ;;  %s762_s25 = scalar_lea.vmem %s761_s24, 32  ;;  %p763_p4 = scmp.lt.s32.totalorder %s1291_s9, %s761_s24 }
  0x44   : > { %656 = vpow2.f32 %v163_v1  ;;  %v192_v61 = vld [vmem:[%s957_s7 + $0xd0] sm:$0xff]  ;;  %v408_v36 = vld [vmem:[%s1066_s4 + $0x28] sm:$0xff]  ;;  %p759_p13 = pneg %p758_p12  ;;  %p764_p10 = scmp.lt.s32.totalorder %s762_s25, %s756_s20 }
  0x46   : > { %p765_p1 = por %p764_p10, %p763_p4 }
  0x48   : > { %p766_p3 = pnand %p765_p1, %p759_p13 }
  0x4e   : > { %v657_v2 = vpop.eup %656 }
  0x4f   : > { %605 = vpush %v657_v2  ;;  %v193_v2 = vld [vmem:[%s957_s7 + $0xd8] sm:$0xff] }
  0x80   : > { %s606_s21 = spop %605 }
  0x81   : > { %v970_v10 = vstv %s606_s21 }
  0x82   : > { %v984_v19 = vmul.f32 %v970_v10, %v166_v5  ;;  %v987_v20 = vmul.f32 %v970_v10, %v167_v6  ;;  %v990_v21 = vmul.f32 %v970_v10, %v168_v7  ;;  %v993_v22 = vmul.f32 %v970_v10, %v169_v8  ;;  %v403_v8 = vld [vmem:[%s1066_s4] sm:$0xff] }
  0x83   : > { %v999_v26 = vmul.f32 %v970_v10, %v170_v9  ;;  %v1002_v27 = vmul.f32 %v970_v10, %v171_v11  ;;  %v1005_v28 = vmul.f32 %v970_v10, %v172_v12  ;;  %v1008_v29 = vmul.f32 %v970_v10, %v173_v13  ;;  %v404_v9 = vld [vmem:[%s1066_s4 + $0x8] sm:$0xff]  ;;  %v194_v11 = vld [vmem:[%s957_s7 + $0xe0] sm:$0xff] }
  0x84   : > { %v1015_v34 = vmul.f32 %v970_v10, %v174_v16  ;;  %v1018_v35 = vmul.f32 %v970_v10, %v175_v17  ;;  %v1026_v38 = vmul.f32 %v970_v10, %v176_v18  ;;  %v1029_v39 = vmul.f32 %v970_v10, %v177_v23  ;;  %v195_v18 = vld [vmem:[%s957_s7 + $0xe8] sm:$0xff]  ;;  %v196_v23 = vld [vmem:[%s957_s7 + $0xf0] sm:$0xff] }
  0x85   : > { %v1032_v40 = vmul.f32 %v970_v10, %v178_v24  ;;  %v1035_v41 = vmul.f32 %v970_v10, %v179_v25  ;;  %v231_v45 = vmax.f32 %v984_v19, %v999_v26  ;;  %v232_v46 = vmax.f32 %v987_v20, %v1002_v27  ;;  %v197_v24 = vld [vmem:[%s957_s7 + $0xf8] sm:$0xff] }
  0x86   : > { %v233_v47 = vmax.f32 %v990_v21, %v1005_v28  ;;  %v234_v48 = vmax.f32 %v993_v22, %v1008_v29  ;;  %v1054_v50 = vmul.f32 %v970_v10, %v180_v30  ;;  %v1057_v51 = vmul.f32 %v970_v10, %v181_v31 }
  0x87   : > { %v1060_v52 = vmul.f32 %v970_v10, %v182_v32  ;;  %v1063_v53 = vmul.f32 %v970_v10, %v183_v33  ;;  %v235_v57 = vmax.f32 %v231_v45, %v1015_v34  ;;  %v236_v58 = vmax.f32 %v232_v46, %v1018_v35 }
  0x88   : > { %v237_v59 = vmax.f32 %v233_v47, %v1026_v38  ;;  %v238_v60 = vmax.f32 %v234_v48, %v1029_v39  ;;  %v1077_v62 = vmul.f32 %v970_v10, %v184_v37  ;;  %v1080_v63 = vmul.f32 %v970_v10, %v185_v42  ;;  %v405_v48 = vld [vmem:[%s1066_s4 + $0x10] sm:$0xff] }
  0x89   : > { %v1083_v0 = vmul.f32 %v970_v10, %v186_v43  ;;  %v1086_v1 = vmul.f32 %v970_v10, %v187_v44  ;;  %v239_v3 = vmax.f32 %v235_v57, %v1032_v40  ;;  %v240_v5 = vmax.f32 %v236_v58, %v1035_v41 }
  0x8a   : > { %v241_v6 = vmax.f32 %v237_v59, %v1054_v50  ;;  %v242_v7 = vmax.f32 %v238_v60, %v1057_v51  ;;  %v1097_v12 = vmul.f32 %v970_v10, %v188_v49  ;;  %v1100_v13 = vmul.f32 %v970_v10, %v189_v54 }
  0x8b   : > { %v1103_v16 = vmul.f32 %v970_v10, %v190_v55  ;;  %v1106_v17 = vmul.f32 %v970_v10, %v191_v56  ;;  %v243_v25 = vmax.f32 %v239_v3, %v1060_v52  ;;  %v244_v30 = vmax.f32 %v240_v5, %v1063_v53 }
  0x8c   : > { %v245_v31 = vmax.f32 %v241_v6, %v1077_v62  ;;  %v246_v32 = vmax.f32 %v242_v7, %v1080_v63  ;;  %v1116_v33 = vmul.f32 %v970_v10, %v192_v61  ;;  %v1119_v37 = vmul.f32 %v970_v10, %v193_v2 }
  0x8d   : > { %v419_v42 = vmul.f32 %v403_v8, %v970_v10  ;;  %v420_v43 = vmul.f32 %v404_v9, %v970_v10  ;;  %v247_v44 = vmax.f32 %v243_v25, %v1083_v0  ;;  %v248_v45 = vmax.f32 %v244_v30, %v1086_v1  ;;  %v407_v30 = vld [vmem:[%s1066_s4 + $0x20] sm:$0xff] }
  0x8e   : > { %v249_v46 = vmax.f32 %v245_v31, %v1097_v12  ;;  %v250_v47 = vmax.f32 %v246_v32, %v1100_v13  ;;  %v1129_v49 = vmul.f32 %v970_v10, %v194_v11  ;;  %v1132_v54 = vmul.f32 %v970_v10, %v195_v18  ;;  %v406_v11 = vld [vmem:[%s1066_s4 + $0x18] sm:$0xff] }
  0x8f   : > { %v1135_v55 = vmul.f32 %v970_v10, %v196_v23  ;;  %v1138_v56 = vmul.f32 %v970_v10, %v197_v24  ;;  %v251_v57 = vmax.f32 %v247_v44, %v1103_v16  ;;  %v252_v58 = vmax.f32 %v248_v45, %v1106_v17 }
  0x90   : > { %v253_v59 = vmax.f32 %v249_v46, %v1116_v33  ;;  %v254_v60 = vmax.f32 %v250_v47, %v1119_v37  ;;  %v421_v61 = vmul.f32 %v405_v48, %v970_v10  ;;  %v439_v2 = vadd.s32 24, %v963_v4 }
  0x91   : > { %v470_v3 = vsel %vm454_vm0, %v419_v42, 0.0  ;;  %v471_v5 = vsel %vm455_vm1, %v420_v43, 0.0  ;;  %v255_v6 = vmax.f32 %v251_v57, %v1129_v49  ;;  %v256_v7 = vmax.f32 %v252_v58, %v1132_v54 }
  0x92   : > { %v257_v8 = vmax.f32 %v253_v59, %v1135_v55  ;;  %v258_v9 = vmax.f32 %v254_v60, %v1138_v56  ;;  %v422_v24 = vmul.f32 %v406_v11, %v970_v10  ;;  %v486_v25 = vadd.f32 %v471_v5, %v470_v3 }
  0x93   : > { %v259_v18 = vmax.f32 %v255_v6, %v256_v7  ;;  %v440_v31 = vadd.s32 32, %v963_v4  ;;  %vm457_vm3 = vcmp.eq.s32.totalorder %v439_v2, %v978_v15  ;;  %v472_v32 = vsel %vm456_vm2, %v421_v61, 0.0  ;;  %v409_v61 = vld [vmem:[%s1066_s4 + $0x30] sm:$0xff] }
  0x94   : > { %v260_v23 = vmax.f32 %v257_v8, %v258_v9  ;;  %v487_v42 = vadd.f32 %v486_v25, %v472_v32  ;;  %v423_v44 = vmul.f32 %v407_v30, %v970_v10  ;;  %v473_v45 = vsel %vm457_vm3, %v422_v24, 0.0  ;;  %v410_v8 = vld [vmem:[%s1066_s4 + $0x38] sm:$0xff]  ;;  %v411_v25 = vld [vmem:[%s1066_s4 + $0x40] sm:$0xff] }
  0x95   : > { %v441_v47 = vadd.s32 40, %v963_v4  ;;  %vm458_vm4 = vcmp.eq.s32.totalorder %v440_v31, %v978_v15  ;;  %v424_v58 = vmul.f32 %v408_v36, %v970_v10  ;;  %v442_v2 = vadd.s32 48, %v963_v4 }
  0x96   : > { %v261_v14 = vmax.f32 %v259_v18, %v260_v23  ;;  %v488_v48 = vadd.f32 %v487_v42, %v473_v45  ;;  %v474_v59 = vsel %vm458_vm4, %v423_v44, 0.0  ;;  %v425_v6 = vmul.f32 %v409_v61, %v970_v10  ;;  %v412_v45 = vld [vmem:[%s1066_s4 + $0x48] sm:$0xff] }
  0x97   : > { %vm459_vm5 = vcmp.eq.s32.totalorder %v441_v47, %v978_v15  ;;  %v443_v9 = vadd.s32 56, %v963_v4  ;;  %vm460_vm6 = vcmp.eq.s32.totalorder %v442_v2, %v978_v15  ;;  %v426_v23 = vmul.f32 %v410_v8, %v970_v10  ;;  %v415_v8 = vld [vmem:[%s1066_s4 + $0x60] sm:$0xff] }
  0x98   : > { %v262_v43 = vrot.slane %v261_v14, 4  ;;  %v489_v3 = vadd.f32 %v488_v48, %v474_v59  ;;  %v475_v7 = vsel %vm459_vm5, %v424_v58, 0.0  ;;  %v476_v24 = vsel %vm460_vm6, %v425_v6, 0.0 }
  0x99   : > { %vm461_vm7 = vcmp.eq.s32.totalorder %v443_v9, %v978_v15  ;;  %v428_v58 = vmul.f32 %v412_v45, %v970_v10 }
  0x9a   : > { %v263_v46 = vmax.f32 %v261_v14, %v262_v43  ;;  %v490_v11 = vadd.f32 %v489_v3, %v475_v7  ;;  %v444_v14 = vadd.s32 64, %v963_v4  ;;  %v427_v43 = vmul.f32 %v411_v25, %v970_v10  ;;  %v414_v3 = vld [vmem:[%s1066_s4 + $0x58] sm:$0xff]  ;;  %v416_v25 = vld [vmem:[%s1066_s4 + $0x68] sm:$0xff] }
  0x9b   : > { %v477_v44 = vsel %vm461_vm7, %v426_v23, 0.0 }
  0x9c   : > { %v264_v57 = vrot.slane %v263_v46, 2  ;;  %v491_v30 = vadd.f32 %v490_v11, %v476_v24  ;;  %vm462_vm8 = vcmp.eq.s32.totalorder %v444_v14, %v978_v15  ;;  %v448_v11 = vadd.s32 96, %v963_v4 }
  0x9d   : > { %v478_v59 = vsel %vm462_vm8, %v427_v43, 0.0  ;;  %v430_v14 = vmul.f32 %v414_v3, %v970_v10 }
  0x9e   : > { %v265_v60 = vmax.f32 %v263_v46, %v264_v57  ;;  %v445_v46 = vadd.s32 72, %v963_v4  ;;  %v492_v36 = vadd.f32 %v491_v30, %v477_v44  ;;  %v449_v30 = vadd.s32 104, %v963_v4 }
  0x9f   : > { %v450_v44 = vadd.s32 112, %v963_v4  ;;  %vm466_vm12 = vcmp.eq.s32.totalorder %v448_v11, %v978_v15 }
  0xa0   : > { %v266_v5 = vrot.slane %v265_v60, 1  ;;  %vm463_vm9 = vcmp.eq.s32.totalorder %v445_v46, %v978_v15  ;;  %v493_v61 = vadd.f32 %v492_v36, %v478_v59  ;;  %vm467_vm13 = vcmp.eq.s32.totalorder %v449_v30, %v978_v15 }
  0xa1   : > { %v479_v9 = vsel %vm463_vm9, %v428_v58, 0.0  ;;  %vm468_vm14 = vcmp.eq.s32.totalorder %v450_v44, %v978_v15 }
  0xa2   : > { %v1175_v18 = vmax.f32 %v265_v60, %v266_v5  ;;  %v446_v60 = vadd.s32 80, %v963_v4  ;;  %v447_v5 = vadd.s32 88, %v963_v4 }
  0xa4   : > { %v268_v31 = vsub.f32 %v984_v19, %v1175_v18  ;;  %v269_v32 = vsub.f32 %v987_v20, %v1175_v18  ;;  %v270_v42 = vsub.f32 %v990_v21, %v1175_v18  ;;  %v271_v47 = vsub.f32 %v993_v22, %v1175_v18  ;;  %v413_v21 = vld [vmem:[%s1066_s4 + $0x50] sm:$0xff] }
  0xa5   : > { %v272_v20 = vsub.f32 %v999_v26, %v1175_v18  ;;  %v273_v22 = vsub.f32 %v1002_v27, %v1175_v18  ;;  %v429_v26 = vmul.f32 %v413_v21, %v970_v10  ;;  %v274_v6 = vsub.f32 %v1005_v28, %v1175_v18 }
  0xa6   : > { %v300_v19 = vmul.f32 1.442695, %v268_v31  ;;  %v302_v48 = vmul.f32 1.442695, %v269_v32  ;;  %v304_v57 = vmul.f32 1.442695, %v270_v42  ;;  %vm464_vm10 = vcmp.eq.s32.totalorder %v446_v60, %v978_v15 }
  0xa7   : > { %v306_v2 = vmul.f32 1.442695, %v271_v47  ;;  %v308_v7 = vmul.f32 1.442695, %v272_v20  ;;  %v494_v27 = vadd.f32 %v493_v61, %v479_v9  ;;  %v275_v23 = vsub.f32 %v1008_v29, %v1175_v18  ;;  %v417_v42 = vld [vmem:[%s1066_s4 + $0x70] sm:$0xff]  ;;  %v418_v47 = vld [vmem:[%s1066_s4 + $0x78] sm:$0xff] }
  0xa8   : > { %658 = vpow2.f32 %v300_v19  ;;  %v310_v24 = vmul.f32 1.442695, %v273_v22  ;;  %v431_v28 = vmul.f32 %v415_v8, %v970_v10  ;;  %vm465_vm11 = vcmp.eq.s32.totalorder %v447_v5, %v978_v15 }
  0xa9   : > { %660 = vpow2.f32 %v302_v48  ;;  %v276_v31 = vsub.f32 %v1015_v34, %v1175_v18  ;;  %v312_v32 = vmul.f32 1.442695, %v274_v6  ;;  %v480_v43 = vsel %vm464_vm10, %v429_v26, 0.0 }
  0xaa   : > { %662 = vpow2.f32 %v304_v57  ;;  %v432_v29 = vmul.f32 %v416_v25, %v970_v10  ;;  %v495_v45 = vadd.f32 %v494_v27, %v480_v43  ;;  %v277_v46 = vsub.f32 %v1018_v35, %v1175_v18 }
  0xab   : > { %664 = vpow2.f32 %v306_v2  ;;  %v314_v36 = vmul.f32 1.442695, %v275_v23  ;;  %v481_v19 = vsel %vm465_vm11, %v430_v14, 0.0  ;;  %v433_v34 = vmul.f32 %v417_v42, %v970_v10 }
  0xac   : > { %666 = vpow2.f32 %v308_v7  ;;  %v451_v20 = vadd.s32 120, %v963_v4  ;;  %v496_v57 = vadd.f32 %v495_v45, %v481_v19  ;;  %v278_v58 = vsub.f32 %v1026_v38, %v1175_v18 }
  0xad   : > { %668 = vpow2.f32 %v310_v24  ;;  %v316_v59 = vmul.f32 1.442695, %v276_v31  ;;  %v482_v35 = vsel %vm466_vm12, %v431_v28, 0.0  ;;  %v434_v61 = vmul.f32 %v418_v47, %v970_v10 }
  0xae   : > { %670 = vpow2.f32 %v312_v32  ;;  %v497_v22 = vadd.f32 %v496_v57, %v482_v35  ;;  %v279_v4 = vsub.f32 %v1029_v39, %v1175_v18  ;;  %v318_v3 = vmul.f32 1.442695, %v277_v46 }
  0xaf   : > { %672 = vpow2.f32 %v314_v36  ;;  %v483_v26 = vsel %vm467_vm13, %v432_v29, 0.0  ;;  %vm469_vm15 = vcmp.eq.s32.totalorder %v451_v20, %v978_v15  ;;  %v280_v7 = vsub.f32 %v1032_v40, %v1175_v18 }
  0xb0   : > { %v498_v38 = vadd.f32 %v497_v22, %v483_v26  ;;  %674 = vpow2.f32 %v316_v59  ;;  %v320_v10 = vmul.f32 1.442695, %v278_v58  ;;  %v484_v8 = vsel %vm468_vm14, %v433_v34, 0.0 }
  0xb1   : > { %v281_v39 = vsub.f32 %v1035_v41, %v1175_v18  ;;  %676 = vpow2.f32 %v318_v3  ;;  %v322_v23 = vmul.f32 1.442695, %v279_v4  ;;  %v485_v24 = vsel %vm469_vm15, %v434_v61, 0.0 }
  0xb2   : > { %v659_v48 = vpop.eup %658  ;;  %v499_v11 = vadd.f32 %v498_v38, %v484_v8  ;;  %v282_v28 = vsub.f32 %v1054_v50, %v1175_v18  ;;  %678 = vpow2.f32 %v320_v10  ;;  %v324_v40 = vmul.f32 1.442695, %v280_v7 }
  0xb3   : > { %v661_v21 = vpop.eup %660  ;;  %v283_v42 = vsub.f32 %v1057_v51, %v1175_v18  ;;  %680 = vpow2.f32 %v322_v23  ;;  %v326_v43 = vmul.f32 1.442695, %v281_v39  ;;  %v284_v45 = vsub.f32 %v1060_v52, %v1175_v18 }
  0xb4   : > { %v364_v60 = vadd.f32 %v661_v21, %v659_v48  ;;  %v663_v2 = vpop.eup %662  ;;  %v500_v14 = vadd.f32 %v499_v11, %v485_v24  ;;  %682 = vpow2.f32 %v324_v40  ;;  %v328_v46 = vmul.f32 1.442695, %v282_v28 }
  0xb5   : > { %v665_v6 = vpop.eup %664  ;;  %v285_v19 = vsub.f32 %v1063_v53, %v1175_v18  ;;  %684 = vpow2.f32 %v326_v43  ;;  %v330_v48 = vmul.f32 1.442695, %v283_v42  ;;  %v286_v57 = vsub.f32 %v1077_v62, %v1175_v18 }
  0xb6   : > { %v365_v5 = vadd.f32 %v663_v2, %v364_v60  ;;  %v667_v27 = vpop.eup %666  ;;  %v501_v31 = vrot.slane %v500_v14, 4  ;;  %686 = vpow2.f32 %v328_v46  ;;  %v332_v21 = vmul.f32 1.442695, %v284_v45 }
  0xb7   : > { %v669_v15 = vpop.eup %668  ;;  %v287_v35 = vsub.f32 %v1080_v63, %v1175_v18  ;;  %688 = vpow2.f32 %v330_v48  ;;  %v334_v60 = vmul.f32 1.442695, %v285_v19  ;;  %v288_v2 = vsub.f32 %v1083_v0, %v1175_v18 }
  0xb8   : > { %v366_v9 = vadd.f32 %v665_v6, %v365_v5  ;;  %v671_v32 = vpop.eup %670  ;;  %v502_v29 = vadd.f32 %v501_v31, %v500_v14  ;;  %690 = vpow2.f32 %v332_v21  ;;  %v336_v4 = vmul.f32 1.442695, %v286_v57 }
  0xb9   : > { %v673_v44 = vpop.eup %672  ;;  %v289_v5 = vsub.f32 %v1086_v1, %v1175_v18  ;;  %692 = vpow2.f32 %v334_v60  ;;  %v338_v63 = vmul.f32 1.442695, %v287_v35  ;;  %v290_v7 = vsub.f32 %v1097_v12, %v1175_v18 }
  0xba   : > { %v367_v25 = vadd.f32 %v667_v27, %v366_v9  ;;  %v503_v50 = vrot.slane %v502_v29, 2  ;;  %v675_v47 = vpop.eup %674  ;;  %694 = vpow2.f32 %v336_v4  ;;  %v340_v10 = vmul.f32 1.442695, %v288_v2 }
  0xbb   : > { %v677_v20 = vpop.eup %676  ;;  %v291_v9 = vsub.f32 %v1100_v13, %v1175_v18  ;;  %696 = vpow2.f32 %v338_v63  ;;  %v342_v11 = vmul.f32 1.442695, %v289_v5  ;;  %v292_v1 = vsub.f32 %v1103_v16, %v1175_v18 }
  0xbc   : > { %v368_v30 = vadd.f32 %v669_v15, %v367_v25  ;;  %v504_v51 = vadd.f32 %v503_v50, %v502_v29  ;;  %v679_v59 = vpop.eup %678  ;;  %698 = vpow2.f32 %v340_v10  ;;  %v344_v23 = vmul.f32 1.442695, %v290_v7 }
  0xbd   : > { %v681_v22 = vpop.eup %680  ;;  %v293_v12 = vsub.f32 %v1106_v17, %v1175_v18  ;;  %700 = vpow2.f32 %v342_v11  ;;  %v346_v14 = vmul.f32 1.442695, %v291_v9  ;;  %v294_v13 = vsub.f32 %v1116_v33, %v1175_v18 }
  0xbe   : > { %v369_v41 = vadd.f32 %v671_v32, %v368_v30  ;;  %v505_v52 = vrot.slane %v504_v51, 1  ;;  %v683_v26 = vpop.eup %682  ;;  %702 = vpow2.f32 %v344_v23  ;;  %v348_v40 = vmul.f32 1.442695, %v292_v1 }
  0xbf   : > { %v685_v6 = vpop.eup %684  ;;  %v295_v16 = vsub.f32 %v1119_v37, %v1175_v18  ;;  %704 = vpow2.f32 %v346_v14  ;;  %v350_v32 = vmul.f32 1.442695, %v293_v12  ;;  %v296_v17 = vsub.f32 %v1129_v49, %v1175_v18 }
  0xc0   : > { %v370_v36 = vadd.f32 %v673_v44, %v369_v41  ;;  %v1253_v53 = vadd.f32 %v505_v52, %v504_v51  ;;  %v687_v8 = vpop.eup %686  ;;  %706 = vpow2.f32 %v348_v40  ;;  %v352_v41 = vmul.f32 1.442695, %v294_v13 }
  0xc1   : > { %v689_v39 = vpop.eup %688  ;;  %v297_v33 = vsub.f32 %v1132_v54, %v1175_v18  ;;  %708 = vpow2.f32 %v350_v32  ;;  %v354_v45 = vmul.f32 1.442695, %v295_v16  ;;  %v298_v37 = vsub.f32 %v1135_v55, %v1175_v18 }
  0xc2   : > { %v371_v34 = vadd.f32 %v675_v47, %v370_v36  ;;  %v507_v3 = vsub.f32 %v1253_v53, %v1175_v18  ;;  %v691_v25 = vpop.eup %690  ;;  %710 = vpow2.f32 %v352_v41  ;;  %v356_v50 = vmul.f32 1.442695, %v296_v17 }
  0xc3   : > { %v693_v28 = vpop.eup %692  ;;  %v299_v49 = vsub.f32 %v1138_v56, %v1175_v18  ;;  %712 = vpow2.f32 %v354_v45  ;;  %v358_v48 = vmul.f32 1.442695, %v297_v33  ;;  %v360_v54 = vmul.f32 1.442695, %v298_v37 }
  0xc4   : > { %v372_v58 = vadd.f32 %v677_v20, %v371_v34  ;;  %v695_v31 = vpop.eup %694  ;;  %714 = vpow2.f32 %v356_v50 }
  0xc5   : > { %v697_v43 = vpop.eup %696  ;;  %716 = vpow2.f32 %v358_v48  ;;  %v362_v21 = vmul.f32 1.442695, %v299_v49 }
  0xc6   : > { %v373_v61 = vadd.f32 %v679_v59, %v372_v58  ;;  %v699_v44 = vpop.eup %698  ;;  %718 = vpow2.f32 %v360_v54 }
  0xc7   : > { %v701_v36 = vpop.eup %700  ;;  %720 = vpow2.f32 %v362_v21 }
  0xc8   : > { %v374_v62 = vadd.f32 %v681_v22, %v373_v61  ;;  %v703_v19 = vpop.eup %702 }
  0xc9   : > { %v705_v51 = vpop.eup %704 }
  0xca   : > { %v375_v38 = vadd.f32 %v683_v26, %v374_v62  ;;  %v707_v57 = vpop.eup %706 }
  0xcb   : > { %v709_v52 = vpop.eup %708 }
  0xcc   : > { %v376_v0 = vadd.f32 %v685_v6, %v375_v38  ;;  %v711_v59 = vpop.eup %710 }
  0xcd   : > { %v713_v60 = vpop.eup %712 }
  0xce   : > { %v377_v27 = vadd.f32 %v687_v8, %v376_v0  ;;  %v715_v56 = vpop.eup %714  ;;  %v508_v0 = vmul.f32 1.442695, %v507_v3 }
  0xcf   : > { %v717_v2 = vpop.eup %716 }
  0xd0   : > { %v378_v24 = vadd.f32 %v689_v39, %v377_v27  ;;  %v719_v62 = vpop.eup %718  ;;  %722 = vpow2.f32 %v508_v0 }
  0xd1   : > { %v721_v5 = vpop.eup %720 }
  0xd2   : > { %v379_v15 = vadd.f32 %v691_v25, %v378_v24 }
  0xd4   : > { %v380_v30 = vadd.f32 %v693_v28, %v379_v15 }
  0xd6   : > { %v381_v42 = vadd.f32 %v695_v31, %v380_v30 }
  0xd8   : > { %v382_v29 = vadd.f32 %v697_v43, %v381_v42 }
  0xda   : > { %v383_v46 = vadd.f32 %v699_v44, %v382_v29  ;;  %v723_v11 = vpop.eup %722 }
  0xdc   : > { %v384_v47 = vadd.f32 %v701_v36, %v383_v46 }
  0xde   : > { %v385_v34 = vadd.f32 %v703_v19, %v384_v47 }
  0xe0   : > { %v386_v20 = vadd.f32 %v705_v51, %v385_v34 }
  0xe2   : > { %v387_v58 = vadd.f32 %v707_v57, %v386_v20 }
  0xe4   : > { %v388_v55 = vadd.f32 %v709_v52, %v387_v58 }
  0xe6   : > { %v389_v35 = vadd.f32 %v711_v59, %v388_v55 }
  0xe8   : > { %v390_v61 = vadd.f32 %v713_v60, %v389_v35 }
  0xea   : > { %v391_v22 = vadd.f32 %v715_v56, %v390_v61 }
  0xec   : > { %v392_v4 = vadd.f32 %v717_v2, %v391_v22 }
  0xee   : > { %v393_v26 = vadd.f32 %v719_v62, %v392_v4 }
  0xf0   : > { %v394_v63 = vadd.f32 %v721_v5, %v393_v26 }
  0xf2   : > { %v395_v38 = vrot.slane %v394_v63, 4 }
  0xf4   : > { %v396_v6 = vadd.f32 %v395_v38, %v394_v63 }
  0xf6   : > { %v397_v7 = vrot.slane %v396_v6, 2 }
  0xf8   : > { %v398_v10 = vadd.f32 %v397_v7, %v396_v6 }
  0xfa   : > { %v399_v8 = vrot.slane %v398_v10, 1 }
  0xfc   : > { %v400_v9 = vadd.f32 %v399_v8, %v398_v10 }
  0xfe   : > { %724 = vrcp.f32 %v400_v9 }
 0x108   : > { %v725_v27 = vpop.eup %724 }
 0x109   : > { %v511_v39 = vmul.f32 %v725_v27, %v723_v11 }
 0x10b   : > { %512 = vst [vmem:[%s160_s8] sm:$0x1] %v511_v39 }
 0x10c   : > { %769 = shalt.err (!%p766_p3)
}
 0x10d   : > { %s770_s26 = scalar_lea.hbm %s1289_s17, 16  ;;  %s774_s30 = scalar_lea.hbm %s1335_s2, 32 }
 0x10e   : > { %p771_p5 = scmp.ne.s32.totalorder %s1289_s17, %s770_s26  ;;  %p775_p9 = scmp.lt.u32.totalorder %s1289_s17, %s1335_s2 }
 0x10f   : > { %p776_p0 = scmp.lt.u32.totalorder %s774_s30, %s770_s26  ;;  %p778_p6 = scmp.lt.u32.totalorder %s770_s26, %s1289_s17 }
 0x110   : > { %p772_p7 = pnand %p771_p5, %p1343_p11 }
 0x111   : > { %p777_p2 = por %p776_p0, %p775_p9 }
 0x112   : > { %p773_p8 = pneg %p772_p7 }
 0x113   : > { %p779_p12 = por %p778_p6, %p777_p2 }
 0x115   : > { %p780_p13 = pnand %p779_p12, %p773_p8 }
 0x117   : > { %783 = shalt.err (!%p780_p13)
}
 0x118   : > { %609 = dma.vmem_to_hbm [thread:$0]  (%p1343_p11), %s1291_s9, 16, %s1289_s17, %s514_s18  }
 0x119 PF: > { %s538_s29 = sand.u32 1, %s810_s11   ;;  %p1344_p4 = scmp.ne.s32.totalorder %s1340_s23, 0 }
 0x11a   : > { %p1345_p10 = scmp.ge.s32.totalorder %s822_s14, 2  ;;  %s539_s21 = scalar_lea.sflag [#allocation5], %s538_s29 }
 0x11c   : > { %p616_p1 = pnand %p1345_p10, %p1344_p4 }
 0x11e   : > { %805 = dma.done.wait (!%p616_p1), %s539_s21, 16  }
 0x11f   : > { %807 = vsyncadd (!%p616_p1), %s539_s21, 4294967280  ;;  %p16_p3 = scmp.ge.s32.totalorder %s872_s16, 4   ;;  %s1346_s11 = smov %s814_s12 }
 0x120   : > { %s1347_s12 = smov %s818_s13  ;;  %s1348_s13 = smov %s884_s19 }
 0x121   : > { %s1349_s14 = smov %s872_s16  ;;  %18 = sbr.rel (!%p16_p3) target bundleno = 7 (0x7), region = 74 }
 0x128   :  { %543 = vsyncpa [#allocation4], 1 }
 0x129   :  { %545 = vsyncpa [#allocation4 + $0x1], 1 }
 0x12a   :  { %546 = vsyncpa [#allocation5], 1 }
 0x12b   :  { %548 = vsyncpa [#allocation5 + $0x1], 1 }

</bundles_post_ra>
